<compile_context>
chip_gen: v7x
topology: tpu7x:2x2x1
jax: 0.10.0
libtpu: 0.0.40
codegen_flags: <defaults>
</compile_context>

<pallas_src>
import jax
import jax.numpy as jnp
from jax.experimental import pallas as pl
from jax.experimental.pallas import tpu as pltpu


def _round_up(n: int, m: int) -> int:
    return ((n + m - 1) // m) * m


def _resnet_stack_kernel(x_ref, w1_ref, b1_ref, w2_ref, b2_ref, w3_ref, b3_ref,
                         o_ref):
    """One batch row tile through L fused LinearResnetBlocks.

    Stacked weights: w1 (L, in, mid), w2 (L, mid, mid), w3 (L, mid, in),
    biases (L, 1, n).  L is a static shape, so the Python loop unrolls and the
    activation never leaves VMEM between blocks.
    """
    md = w1_ref.dtype                           # matmul input dtype (e.g. bf16)
    x = x_ref[...].astype(jnp.float32)          # exact f32 residual carry
    num_blocks = w1_ref.shape[0]
    for l in range(num_blocks):
        h = jnp.dot(x.astype(md), w1_ref[l], preferred_element_type=jnp.float32)
        h = jnp.maximum(h + b1_ref[l], 0.0)
        h = jnp.dot(h.astype(md), w2_ref[l], preferred_element_type=jnp.float32)
        h = jnp.maximum(h + b2_ref[l], 0.0)
        h = jnp.dot(h.astype(md), w3_ref[l], preferred_element_type=jnp.float32)
        h = jnp.maximum(h + b3_ref[l], 0.0)
        x = h + x                               # residual in f32
    o_ref[...] = x.astype(o_ref.dtype)


def linear_resnet_stack(x, blocks, *, block_rows: int = 1024,
                        matmul_dtype=jnp.bfloat16):
    """Fused forward pass of a chain of LinearResnetBlocks.

    x: (B, in_ch).  blocks: sequence of (w1, b1, w2, b2, w3, b3) with
    w1 (in_ch, mid_ch), w2 (mid_ch, mid_ch), w3 (mid_ch, in_ch),
    biases shaped (n,) or (1, n).  Weights must be stored pre-transposed
    (y = x @ W + b), matching the torch Linear math.
    """
    out_dtype = x.dtype
    B, in_ch = x.shape
    mid_ch = blocks[0][0].shape[1]
    L = len(blocks)
    md = jnp.dtype(matmul_dtype) if matmul_dtype is not None else jnp.dtype(x.dtype)

    def as_row(b, n):
        return jnp.asarray(b).reshape(1, n).astype(jnp.float32)

    # Weights cast once to the matmul dtype (amortized / jit-hoisted); biases
    # stay f32 so the VPU epilogue is exact on every generation.
    w1s = jnp.stack([jnp.asarray(blk[0]).astype(md) for blk in blocks])
    b1s = jnp.stack([as_row(blk[1], mid_ch) for blk in blocks])
    w2s = jnp.stack([jnp.asarray(blk[2]).astype(md) for blk in blocks])
    b2s = jnp.stack([as_row(blk[3], mid_ch) for blk in blocks])
    w3s = jnp.stack([jnp.asarray(blk[4]).astype(md) for blk in blocks])
    b3s = jnp.stack([as_row(blk[5], in_ch) for blk in blocks])

    # ---- batch row tile: big tiles for throughput; for small/medium batches
    # aim for >= 4 grid steps so v7x's two TCs each get >= 2 pipelined steps.
    SUB = 8
    tb = min(_round_up(block_rows, SUB), _round_up(B, SUB))
    min_steps = 4
    if pl.cdiv(B, tb) < min_steps:
        tb = max(SUB, _round_up(pl.cdiv(B, min_steps), SUB))
    grid = (pl.cdiv(B, tb),)     # ragged last block handled by Pallas, no padding

    x_spec = pl.BlockSpec((tb, in_ch), lambda i: (i, 0))
    o_spec = pl.BlockSpec((tb, in_ch), lambda i: (i, 0))
    # Constant index_maps -> weights/biases fetched once, VMEM-resident.
    resident = lambda shape: pl.BlockSpec(shape, lambda i: (0, 0, 0))

    # ---- cost estimate from the true (unpadded) dims -------------------------
    flops = 2 * B * L * (in_ch * mid_ch + mid_ch * mid_ch + mid_ch * in_ch)
    bytes_accessed = (
        x.size * jnp.dtype(x.dtype).itemsize
        + B * in_ch * jnp.dtype(out_dtype).itemsize
        + (w1s.size + w2s.size + w3s.size) * md.itemsize
        + (b1s.size + b2s.size + b3s.size) * 4)

    # ---- VMEM budget: double-buffered x/out tiles + (double-buffered) weights.
    act_bytes = 2 * tb * in_ch * (jnp.dtype(x.dtype).itemsize
                                  + jnp.dtype(out_dtype).itemsize)
    wgt_bytes = 2 * ((w1s.size + w2s.size + w3s.size) * md.itemsize
                     + (b1s.size + b2s.size + b3s.size) * 4)
    vmem_limit = min(64 << 20, max(32 << 20, int(1.5 * (act_bytes + wgt_bytes))))

    return pl.pallas_call(
        _resnet_stack_kernel,
        out_shape=jax.ShapeDtypeStruct((B, in_ch), out_dtype),
        grid_spec=pltpu.PrefetchScalarGridSpec(
            num_scalar_prefetch=0,
            grid=grid,
            in_specs=[
                x_spec,
                resident((L, in_ch, mid_ch)), resident((L, 1, mid_ch)),
                resident((L, mid_ch, mid_ch)), resident((L, 1, mid_ch)),
                resident((L, mid_ch, in_ch)), resident((L, 1, in_ch)),
            ],
            out_specs=o_spec,
        ),
        compiler_params=pltpu.CompilerParams(
            dimension_semantics=("parallel",),
            vmem_limit_bytes=vmem_limit),
        cost_estimate=pl.CostEstimate(
            flops=flops, transcendentals=0, bytes_accessed=bytes_accessed),
    )(x, w1s, b1s, w2s, b2s, w3s, b3s)


def linear_resnet_block(x, w1, b1, w2, b2, w3, b3, **kwargs):
    """Forward of a single LinearResnetBlock (fused stack of length 1)."""
    return linear_resnet_stack(x, [(w1, b1, w2, b2, w3, b3)], **kwargs)


def _reference_block(x, w1, b1, w2, b2, w3, b3):
    h = jnp.maximum(x @ w1 + b1, 0.0)
    h = jnp.maximum(h @ w2 + b2, 0.0)
    h = jnp.maximum(h @ w3 + b3, 0.0)
    return h + x


if __name__ == "__main__":
    in_ch, mid_ch = 32, 64
    key = jax.random.PRNGKey(0)
    keys = jax.random.split(key, 13)

    # torch Linear default init scale ~ 1/sqrt(fan_in)
    def init_linear(kw, kb, fan_in, fan_out):
        bound = 1.0 / (fan_in ** 0.5)
        w = jax.random.uniform(kw, (fan_in, fan_out), jnp.float32, -bound, bound)
        b = jax.random.uniform(kb, (1, fan_out), jnp.float32, -bound, bound)
        return w, b

    w1a, b1a = init_linear(keys[0], keys[1], in_ch, mid_ch)
    w2a, b2a = init_linear(keys[2], keys[3], mid_ch, mid_ch)
    w3a, b3a = init_linear(keys[4], keys[5], mid_ch, in_ch)
    w1b, b1b = init_linear(keys[6], keys[7], in_ch, mid_ch)
    w2b, b2b = init_linear(keys[8], keys[9], mid_ch, mid_ch)
    w3b, b3b = init_linear(keys[10], keys[11], mid_ch, in_ch)

    block_a = (w1a, b1a, w2a, b2a, w3a, b3a)
    block_b = (w1b, b1b, w2b, b2b, w3b, b3b)

    # Batch 27: not a multiple of the row tile -> exercises the ragged last
    # grid block (no wrapper-side padding or output slicing).
    x = jax.random.normal(keys[12], (27, in_ch), dtype=jnp.float32)
    ref = _reference_block(x, *block_a)

    # 1) exact f32 matmul path
    out_f32 = jax.block_until_ready(
        linear_resnet_block(x, *block_a, matmul_dtype=jnp.float32))
    assert out_f32.shape == (27, in_ch)
    assert jnp.allclose(out_f32, ref, atol=1e-5, rtol=1e-5), "f32 mismatch"

    # 2) default bf16-matmul path (f32 accumulation, f32 bias/ReLU/residual;
    #    the residual uses the exact f32 x since the cast happens in-kernel).
    out_bf16 = jax.block_until_ready(linear_resnet_block(x, *block_a))
    assert jnp.allclose(out_bf16, ref, atol=5e-2, rtol=5e-2), "bf16 mismatch"

    # 3) fused 2-block stack: activation never leaves VMEM between blocks.
    ref2 = _reference_block(ref, *block_b)
    out2 = jax.block_until_ready(
        linear_resnet_stack(x, [block_a, block_b], matmul_dtype=jnp.float32))
    assert jnp.allclose(out2, ref2, atol=1e-4, rtol=1e-4), "fused stack mismatch"

    print("KERNEL_OK")
</pallas_src>

<mosaic_0001>
module attributes {stable_mosaic.version = 11 : i64} {
  func.func @_resnet_stack_kernel(%arg0: i32, %arg1: memref<8x32xf32, #tpu.memory_space<vmem>>, %arg2: memref<1x32x64xf32, #tpu.memory_space<vmem>>, %arg3: memref<1x1x64xf32, #tpu.memory_space<vmem>>, %arg4: memref<1x64x64xf32, #tpu.memory_space<vmem>>, %arg5: memref<1x1x64xf32, #tpu.memory_space<vmem>>, %arg6: memref<1x64x32xf32, #tpu.memory_space<vmem>>, %arg7: memref<1x1x32xf32, #tpu.memory_space<vmem>>, %arg8: memref<8x32xf32, #tpu.memory_space<vmem>>) attributes {dimension_semantics = [#tpu.dimension_semantics<parallel>], iteration_bounds = array<i64: 4>, scalar_prefetch = 0 : i64, scratch_operands = 0 : i64, tpu.core_type = #tpu.core_type<tc>, window_params = [{transform_indices = @transform_0, window_bounds = array<i64: 8, 32>}, {pipeline_mode = #tpu.pipeline_mode<synchronous>, transform_indices = @transform_1, window_bounds = array<i64: 1, 32, 64>}, {pipeline_mode = #tpu.pipeline_mode<synchronous>, transform_indices = @transform_2, window_bounds = array<i64: 1, 1, 64>}, {pipeline_mode = #tpu.pipeline_mode<synchronous>, transform_indices = @transform_3, window_bounds = array<i64: 1, 64, 64>}, {pipeline_mode = #tpu.pipeline_mode<synchronous>, transform_indices = @transform_4, window_bounds = array<i64: 1, 1, 64>}, {pipeline_mode = #tpu.pipeline_mode<synchronous>, transform_indices = @transform_5, window_bounds = array<i64: 1, 64, 32>}, {pipeline_mode = #tpu.pipeline_mode<synchronous>, transform_indices = @transform_6, window_bounds = array<i64: 1, 1, 32>}, {transform_indices = @transform_7, window_bounds = array<i64: 8, 32>}]} {
    %c0 = arith.constant 0 : index
    %c0_0 = arith.constant 0 : index
    %0 = vector.load %arg1[%c0, %c0_0] : memref<8x32xf32, #tpu.memory_space<vmem>>, vector<8x32xf32>
    %c0_1 = arith.constant 0 : index
    %c0_2 = arith.constant 0 : index
    %c0_3 = arith.constant 0 : index
    %1 = vector.load %arg2[%c0_1, %c0_2, %c0_3] : memref<1x32x64xf32, #tpu.memory_space<vmem>>, vector<1x32x64xf32>
    %2 = vector.shape_cast %1 : vector<1x32x64xf32> to vector<32x64xf32>
    %cst = arith.constant dense<0.000000e+00> : vector<8x64xf32>
    %3 = tpu.matmul %0, %2, %cst {dimension_numbers = #tpu.dot_dimension_numbers<[1], [0], [0], [1], [0, 0, 1, 1], [], []>} : vector<8x32xf32>, vector<32x64xf32>, vector<8x64xf32> -> vector<8x64xf32>
    %c0_4 = arith.constant 0 : index
    %c0_5 = arith.constant 0 : index
    %c0_6 = arith.constant 0 : index
    %4 = vector.load %arg3[%c0_4, %c0_5, %c0_6] : memref<1x1x64xf32, #tpu.memory_space<vmem>>, vector<1x1x64xf32>
    %5 = vector.shape_cast %4 : vector<1x1x64xf32> to vector<1x64xf32>
    %6 = vector.broadcast %5 : vector<1x64xf32> to vector<8x64xf32>
    %7 = arith.addf %3, %6 : vector<8x64xf32>
    %cst_7 = arith.constant 0.000000e+00 : f32
    %8 = vector.broadcast %cst_7 : f32 to vector<8x64xf32>
    %9 = arith.maximumf %7, %8 : vector<8x64xf32>
    %c0_8 = arith.constant 0 : index
    %c0_9 = arith.constant 0 : index
    %c0_10 = arith.constant 0 : index
    %10 = vector.load %arg4[%c0_8, %c0_9, %c0_10] : memref<1x64x64xf32, #tpu.memory_space<vmem>>, vector<1x64x64xf32>
    %11 = vector.shape_cast %10 : vector<1x64x64xf32> to vector<64x64xf32>
    %cst_11 = arith.constant dense<0.000000e+00> : vector<8x64xf32>
    %12 = tpu.matmul %9, %11, %cst_11 {dimension_numbers = #tpu.dot_dimension_numbers<[1], [0], [0], [1], [0, 0, 1, 1], [], []>} : vector<8x64xf32>, vector<64x64xf32>, vector<8x64xf32> -> vector<8x64xf32>
    %c0_12 = arith.constant 0 : index
    %c0_13 = arith.constant 0 : index
    %c0_14 = arith.constant 0 : index
    %13 = vector.load %arg5[%c0_12, %c0_13, %c0_14] : memref<1x1x64xf32, #tpu.memory_space<vmem>>, vector<1x1x64xf32>
    %14 = vector.shape_cast %13 : vector<1x1x64xf32> to vector<1x64xf32>
    %15 = vector.broadcast %14 : vector<1x64xf32> to vector<8x64xf32>
    %16 = arith.addf %12, %15 : vector<8x64xf32>
    %cst_15 = arith.constant 0.000000e+00 : f32
    %17 = vector.broadcast %cst_15 : f32 to vector<8x64xf32>
    %18 = arith.maximumf %16, %17 : vector<8x64xf32>
    %c0_16 = arith.constant 0 : index
    %c0_17 = arith.constant 0 : index
    %c0_18 = arith.constant 0 : index
    %19 = vector.load %arg6[%c0_16, %c0_17, %c0_18] : memref<1x64x32xf32, #tpu.memory_space<vmem>>, vector<1x64x32xf32>
    %20 = vector.shape_cast %19 : vector<1x64x32xf32> to vector<64x32xf32>
    %cst_19 = arith.constant dense<0.000000e+00> : vector<8x32xf32>
    %21 = tpu.matmul %18, %20, %cst_19 {dimension_numbers = #tpu.dot_dimension_numbers<[1], [0], [0], [1], [0, 0, 1, 1], [], []>} : vector<8x64xf32>, vector<64x32xf32>, vector<8x32xf32> -> vector<8x32xf32>
    %c0_20 = arith.constant 0 : index
    %c0_21 = arith.constant 0 : index
    %c0_22 = arith.constant 0 : index
    %22 = vector.load %arg7[%c0_20, %c0_21, %c0_22] : memref<1x1x32xf32, #tpu.memory_space<vmem>>, vector<1x1x32xf32>
    %23 = vector.shape_cast %22 : vector<1x1x32xf32> to vector<1x32xf32>
    %24 = vector.broadcast %23 : vector<1x32xf32> to vector<8x32xf32>
    %25 = arith.addf %21, %24 : vector<8x32xf32>
    %cst_23 = arith.constant 0.000000e+00 : f32
    %26 = vector.broadcast %cst_23 : f32 to vector<8x32xf32>
    %27 = arith.maximumf %25, %26 : vector<8x32xf32>
    %28 = arith.addf %27, %0 : vector<8x32xf32>
    %c0_24 = arith.constant 0 : index
    %c0_25 = arith.constant 0 : index
    %29 = vector.load %arg8[%c0_24, %c0_25] : memref<8x32xf32, #tpu.memory_space<vmem>>, vector<8x32xf32>
    tpu.vector_store %arg8[%c0_24, %c0_25], %28 {strides = array<i32>} : memref<8x32xf32, #tpu.memory_space<vmem>>, vector<8x32xf32>,
    return
  }
  func.func @transform_0(%arg0: i32) -> (i32, i32) {
    %c0_i32 = arith.constant 0 : i32
    %c0_i32_0 = arith.constant 0 : i32
    return %arg0, %c0_i32 : i32, i32
  }
  func.func @transform_1(%arg0: i32) -> (i32, i32, i32) {
    %c0_i32 = arith.constant 0 : i32
    %c0_i32_0 = arith.constant 0 : i32
    %c0_i32_1 = arith.constant 0 : i32
    %c0_i32_2 = arith.constant 0 : i32
    return %c0_i32, %c0_i32_0, %c0_i32_1 : i32, i32, i32
  }
  func.func @transform_2(%arg0: i32) -> (i32, i32, i32) {
    %c0_i32 = arith.constant 0 : i32
    %c0_i32_0 = arith.constant 0 : i32
    %c0_i32_1 = arith.constant 0 : i32
    %c0_i32_2 = arith.constant 0 : i32
    return %c0_i32, %c0_i32_0, %c0_i32_1 : i32, i32, i32
  }
  func.func @transform_3(%arg0: i32) -> (i32, i32, i32) {
    %c0_i32 = arith.constant 0 : i32
    %c0_i32_0 = arith.constant 0 : i32
    %c0_i32_1 = arith.constant 0 : i32
    %c0_i32_2 = arith.constant 0 : i32
    return %c0_i32, %c0_i32_0, %c0_i32_1 : i32, i32, i32
  }
  func.func @transform_4(%arg0: i32) -> (i32, i32, i32) {
    %c0_i32 = arith.constant 0 : i32
    %c0_i32_0 = arith.constant 0 : i32
    %c0_i32_1 = arith.constant 0 : i32
    %c0_i32_2 = arith.constant 0 : i32
    return %c0_i32, %c0_i32_0, %c0_i32_1 : i32, i32, i32
  }
  func.func @transform_5(%arg0: i32) -> (i32, i32, i32) {
    %c0_i32 = arith.constant 0 : i32
    %c0_i32_0 = arith.constant 0 : i32
    %c0_i32_1 = arith.constant 0 : i32
    %c0_i32_2 = arith.constant 0 : i32
    return %c0_i32, %c0_i32_0, %c0_i32_1 : i32, i32, i32
  }
  func.func @transform_6(%arg0: i32) -> (i32, i32, i32) {
    %c0_i32 = arith.constant 0 : i32
    %c0_i32_0 = arith.constant 0 : i32
    %c0_i32_1 = arith.constant 0 : i32
    %c0_i32_2 = arith.constant 0 : i32
    return %c0_i32, %c0_i32_0, %c0_i32_1 : i32, i32, i32
  }
  func.func @transform_7(%arg0: i32) -> (i32, i32) {
    %c0_i32 = arith.constant 0 : i32
    %c0_i32_0 = arith.constant 0 : i32
    return %arg0, %c0_i32 : i32, i32
  }
}

</mosaic_0001>

<bundles_post_ra>
// kernel: tpu_custom_call.1
= control target key start
LH: loop header
LB: loop body
LE: loop exit
PB: predicated region body
PF: predicated region fallthrough
CT: control target
= control target key end

     0   :  { %12 = vsyncpa [#allocation3], 0  ;;  %s1157_s0 = inlined_call_operand.vmem [shape: f32[27,32], index: 0, kind: input, shape index: {}]   ;;  %s1158_s1 = inlined_call_operand.hbm [shape: f32[1,32,64], index: 1, kind: input, shape index: {}]   ;;  %s1159_s2 = inlined_call_operand.vmem [shape: f32[1,1,64], index: 2, kind: input, shape index: {}]   ;;  %s1160_s3 = inlined_call_operand.vmem [shape: f32[1,64,64], index: 3, kind: input, shape index: {}]   ;;  %s1161_s4 = inlined_call_operand.vmem [shape: f32[1,1,64], index: 4, kind: input, shape index: {}]   ;;  %s1162_s5 = inlined_call_operand.vmem [shape: f32[1,64,32], index: 5, kind: input, shape index: {}]   ;;  %s1163_s6 = inlined_call_operand.vmem [shape: f32[1,1,32], index: 6, kind: input, shape index: {}]   ;;  %s1164_s7 = inlined_call_operand.hbm [shape: f32[27,32], index: 7, kind: output, shape index: {}]  }
   0x1   :  { %13 = vsyncpa [#allocation4], 0 }
   0x2   :  { %15 = vsyncpa [#allocation4 + $0x1], 0  ;;  %s960_s24 = smov 0   ;;  %s962_s25 = smov 0  }
   0x3   :  { %s964_s26 = smov 0   ;;  %s966_s27 = smov 0  }
   0x4 LB: > { %s981_s28 = sadd.s32 4294967295, %s911_s27   ;;  %s642_s29 = sadd.s32 4294967294, %s911_s27   ;;  %s911_s27 = sphi %s966_s27, %s1180_s27   ;;  %s907_s26 = sphi %s964_s26, %s1179_s26   ;;  %s903_s25 = sphi %s962_s25, %s1178_s25   ;;  %s899_s24 = sphi %s960_s24, %s1177_s24  }
   0x5   : > { %s985_s30 = sadd.s32 1, %s911_s27   ;;  %s180_s8 = sadd.s32 1, %s907_s26 }
   0x6   : > { %s177_s9 = ssub.s32 %s911_s27, %s985_s30  ;;  %p190_p0 = scmp.ne.s32.totalorder %s907_s26, %s903_s25 }
   0x7   : > { %p178_p1 = scmp.eq.s32.totalorder %s177_s9, 0  ;;  %p191_p2 = scmp.eq.s32.totalorder %s981_s28, 3 }
   0x8   : > { %p196_p3 = scmp.ne.s32.totalorder %s903_s25, %s899_s24  ;;  %p197_p4 = scmp.eq.s32.totalorder %s642_s29, 3 }
   0x9   : > { %s996_s10 = scalar_select %p178_p1, %s907_s26, %s180_s8  }
   0xa   : > { %p998_p5 = por %p191_p2, %p190_p0  ;;  %p1002_p6 = por %p197_p4, %p196_p3 }
   0xb   : > { %p643_p7 = scmp.ge.s32.totalorder %s911_s27, 1  ;;  %p204_p8 = scmp.lt.s32.totalorder %s911_s27, 5 }
   0xc   : > { %s1168_s11 = scalar_select %p998_p5, 1, 0 }
   0xd   : > { %s1169_s12 = scalar_select %p1002_p6, 1, 0 }
   0xe   : > { %p1165_p9 = scmp.eq.s32.totalorder %s981_s28, 0  ;;  %p1009_p10 = pnand %p643_p7, %p204_p8 }
   0xf   : > { %s913_s14 = smov [#allocation2]   ;;  %s817_s19 = scalar_lea.hbm %s1158_s1, 512 }
  0x10   : > { %s1170_s13 = scalar_select %p1009_p10, 1, 0 }
  0x11   : > { %s216_s15 = sshll.u32 %s913_s14, 4  ;;  %p768_p11 = pneg %p1009_p10  ;;  %s217_s15 = int_to_ptr.vmem [resolvable:$true] %s216_s15 }
  0x12   : > { %p818_p13 = scmp.ne.s32.totalorder %s1158_s1, %s817_s19  ;;  %p824_p3 = scmp.lt.u32.totalorder %s817_s19, %s1158_s1 }
  0x13   : > { %p1017_p12 = pnand %p1165_p9, %p768_p11 }
  0x15   : > { %p819_p0 = pneg %p1017_p12 }
  0x17   : > { %p820_p1 = pnand %p819_p0, %p818_p13 }
  0x19   : > { %p821_p2 = pneg %p820_p1 }
  0x1b   : > { %p826_p4 = pnand %p824_p3, %p821_p2 }
  0x1d   : > { %829 = shalt.err (!%p826_p4)
}
  0x1e   : > { %s830_s29 = scalar_lea.vmem %s217_s15, 512  ;;  %p838_p9 = scmp.lt.s32.totalorder %s217_s15, %s217_s15 }
  0x1f   : > { %p831_p7 = scmp.ne.s32.totalorder %s217_s15, %s830_s29  ;;  %p839_p6 = scmp.lt.s32.totalorder %s830_s29, %s830_s29 }
  0x21   : > { %p833_p8 = pnand %p831_p7, %p819_p0  ;;  %p840_p5 = por %p839_p6, %p838_p9 }
  0x23   : > { %p834_p11 = pneg %p833_p8 }
  0x25   : > { %p841_p10 = pnand %p840_p5, %p834_p11 }
  0x27   : > { %844 = shalt.err (!%p841_p10)
}
  0x28   : > { %s914_s8 = smov 128   ;;  %s915_s9 = smov 8  }
  0x29   : > { %771 = dma.hbm_to_vmem [thread:$0]  (!%p1017_p12), %s1158_s1, 512, %s217_s15, [#allocation3], %s914_s8, %s914_s8, %s915_s9  }
  0x2a   : > { %p1172_p13 = scmp.ne.s32.totalorder %s1170_s13, 0 }
  0x2b   : > { %p1173_p1 = scmp.eq.s32.totalorder (!%p1172_p13), %s981_s28, 0 }
  0x2c   : > { %254 = sbr.rel (%p1172_p13) target bundleno = 726 (0x2d6), region = 48 }
  0x33   : > { %890 = dma.done.wait (%p1173_p1), [#allocation3], 512   ;;  %p1174_p0 = pmov %p1173_p1 }
  0x34   : > { %p285_p5 = scmp.lt.s32.totalorder %s981_s28, 3  ;;  %v916_v0 = vmov 0.0|0.0   ;;  %vm917_vm0 = vmmov 0   ;;  %v918_v1 = vmov 0.0   ;;  %v290_v2 = vld [vmem:[#allocation2] sm:$0xff]  ;;  %v291_v3 = vld [vmem:[#allocation2 + $0x8] sm:$0xff] }
  0x35   : > { %892 = vsyncadd (%p1174_p0), [#allocation3], 4294966784  ;;  %732 = vmatprep.subr.bf16.mxu0 %v916_v0  ;;  %691 = vmatprep.mubr.msk.f32.mxu0 %vm917_vm0, %v918_v1  ;;  %v292_v4 = vld [vmem:[#allocation2 + $0x10] sm:$0xff]  ;;  %v733_v5 = vpack.c.bf16 %v291_v3, %v290_v2  ;;  %v293_v6 = vld [vmem:[#allocation2 + $0x18] sm:$0xff]  ;;  %vm301_vm1 = vcmask 261120   ;;  %vm391_vm2 = vcmask 523264  }
  0x36   : > { %738 = vmatprep.subr.bf16.mxu1 %v916_v0  ;;  %710 = vmatprep.mubr.msk.f32.mxu1 %vm917_vm0, %v918_v1  ;;  %s286_s13 = scalar_select %p285_p5, %s981_s28, 3  ;;  %v376_v7 = vld [vmem:[%s1160_s3] sm:$0xff]  ;;  %v377_v8 = vld [vmem:[%s1160_s3 + $0x8] sm:$0xff]  ;;  %v378_v9 = vld [vmem:[%s1160_s3 + $0x10] sm:$0xff]  ;;  %v736_v11 = vpack.c.bf16 %v293_v6, %v292_v4 }
  0x37   : > { %v379_v10 = vld [vmem:[%s1160_s3 + $0x18] sm:$0xff]  ;;  %734 = vmatpush3.bf16.msra.mxu0 %v733_v5  ;;  %v739_v12 = vpack.c.bf16 %v377_v8, %v376_v7  ;;  %v380_v14 = vld [vmem:[%s1160_s3 + $0x20] sm:$0xff]  ;;  %v381_v15 = vld [vmem:[%s1160_s3 + $0x28] sm:$0xff]  ;;  %s282_s17 = sand.u32 1, %s903_s25   ;;  %p1175_p9 = scmp.ne.s32.totalorder %s1168_s11, 0 }
  0x38   : > { %s649_s15 = sshll.u32 %s286_s13, 3  ;;  %735 = vmatprep.subr.bf16.mxu0 %v916_v0  ;;  %v742_v13 = vpack.c.bf16 %v379_v10, %v378_v9  ;;  %v745_v17 = vpack.c.bf16 %v381_v15, %v380_v14  ;;  %v382_v18 = vld [vmem:[%s1160_s3 + $0x30] sm:$0xff]  ;;  %v383_v19 = vld [vmem:[%s1160_s3 + $0x38] sm:$0xff]  ;;  %v466_v21 = vld [vmem:[%s1162_s5] sm:$0xff]  ;;  %s648_s13 = sshll.u32 %s282_s17, 3 }
  0x39   : > { %s288_s14 = scalar_lea.vmem %s1157_s0, %s649_s15  ;;  %740 = vmatpush3.bf16.msra.mxu1 %v739_v12  ;;  %v748_v20 = vpack.c.bf16 %v383_v19, %v382_v18  ;;  %v467_v22 = vld [vmem:[%s1162_s5 + $0x8] sm:$0xff]  ;;  %v468_v23 = vld [vmem:[%s1162_s5 + $0x10] sm:$0xff]  ;;  %v469_v25 = vld [vmem:[%s1162_s5 + $0x18] sm:$0xff]  ;;  %s657_s15 = sshll.u32 %s981_s28, 7 }
  0x3a   : > { %741 = vmatprep.subr.bf16.mxu1 %v916_v0  ;;  %v289_v16 = vld [vmem:[%s288_s14] sm:$0xff]  ;;  %v751_v24 = vpack.c.bf16 %v467_v22, %v466_v21  ;;  %v754_v26 = vpack.c.bf16 %v469_v25, %v468_v23  ;;  %v471_v28 = vld [vmem:[%s1162_s5 + $0x28] sm:$0xff]  ;;  %v472_v35 = vld [vmem:[%s1162_s5 + $0x30] sm:$0xff]  ;;  %s284_s19 = scalar_lea.vmem [#allocation5], %s648_s13  ;;  %s1114_s23 = scalar_lea.hbm %s1164_s7, %s657_s15 }
  0x3b   : > { %737 = vmatpush3.bf16.msra.mxu0 %v736_v11  ;;  %v470_v27 = vld [vmem:[%s1162_s5 + $0x20] sm:$0xff]  ;;  %v473_v36 = vld [vmem:[%s1162_s5 + $0x38] sm:$0xff]  ;;  %s571_s20 = sshll.u32 %s284_s19, 4  ;;  %s558_s29 = scalar_lea.sflag [#allocation4], %s282_s17  ;;  %s1116_s20 = int_to_ptr.vmem [resolvable:$true] %s571_s20 }
  0x3c   : > { %750 = vmatprep.subr.bf16.mxu0 %v916_v0  ;;  %v757_v29 = vpack.c.bf16 %v471_v28, %v470_v27  ;;  %v650_v30 = vld [vmem:[%s1159_s2] ss:$0 sm:$0xff]  ;;  %v760_v37 = vpack.c.bf16 %v473_v36, %v472_v35  ;;  %s845_s8 = scalar_lea.vmem %s1116_s20, 128  ;;  %s919_s28 = smov [#allocation5]  }
  0x3d   : > { %743 = vmatpush3.bf16.msra.mxu1 %v742_v13  ;;  %v652_v38 = vld [vmem:[%s1161_s4] ss:$0 sm:$0xff]  ;;  %p846_p6 = scmp.ne.s32.totalorder %s1116_s20, %s845_s8  ;;  %s849_s9 = sshll.u32 %s919_s28, 4  ;;  %s850_s9 = int_to_ptr.vmem [resolvable:$false] %s849_s9 }
  0x3e   : > { %692 = vmatmul.mubr.msk.f32.vlgmr.msra.gmra.mrb[0].mxu0 %vm301_vm1, %v289_v16  ;;  %744 = vmatprep.subr.bf16.mxu1 %v916_v0  ;;  %v654_v43 = vld [vmem:[%s1163_s6] ss:$0 sm:$0xff]  ;;  %s851_s14 = scalar_lea.vmem %s850_s9, 256  ;;  %p852_p2 = scmp.lt.s32.totalorder %s1116_s20, %s850_s9 }
  0x3f   : > { %729 = vmatprep.mubr.msk.f32.mxu0 %vm917_vm0, %v918_v1  ;;  %752 = vmatpush3.bf16.msra.mxu0 %v751_v24  ;;  %p847_p10 = pnand %p846_p6, %p1175_p9  ;;  %p853_p3 = scmp.lt.s32.totalorder %s851_s14, %s845_s8 }
  0x40   : > { %753 = vmatprep.subr.bf16.mxu0 %v916_v0 }
  0x41   : > { %746 = vmatpush3.bf16.msra.mxu1 %v745_v17  ;;  %p848_p12 = pneg %p847_p10  ;;  %p854_p4 = por %p853_p3, %p852_p2 }
  0x42   : > { %747 = vmatprep.subr.bf16.mxu1 %v916_v0 }
  0x43   : > { %755 = vmatpush3.bf16.msra.mxu0 %v754_v26  ;;  %p855_p7 = pnand %p854_p4, %p848_p12 }
  0x44   : > { %756 = vmatprep.subr.bf16.mxu0 %v916_v0 }
  0x45   : > { %749 = vmatpush3.bf16.msra.mxu1 %v748_v20 }
  0x47   : > { %758 = vmatpush3.bf16.msra.mxu0 %v757_v29 }
  0x48   : > { %759 = vmatprep.subr.bf16.mxu0 %v916_v0 }
  0x4b   : > { %761 = vmatpush3.bf16.msra.mxu0 %v760_v37 }
 0x111   : > { %v371_v31 = vpop.f32.mrb[0].mxu0 }
 0x112   : > { %v372_v32 = vadd.f32 %v650_v30, %v371_v31  ;;  %v693_v33 = vpop.f32.mrb[1].mxu0 }
 0x114   : > { %v375_v34 = vmax.f32 %v372_v32, 0.0 }
 0x116   : > { %711 = vmatmul.mubr.msk.f32.vlgmr.msra.gmra.mrb[0].mxu1 %vm391_vm2, %v375_v34 }
 0x1e9   : > { %v461_v39 = vpop.f32.mrb[0].mxu1 }
 0x1ea   : > { %v462_v40 = vadd.f32 %v652_v38, %v461_v39  ;;  %v712_v41 = vpop.f32.mrb[1].mxu1 }
 0x1ec   : > { %v465_v42 = vmax.f32 %v462_v40, 0.0 }
 0x1ee   : > { %730 = vmatmul.mubr.msk.f32.vlgmr.msra.gmra.mrb[2].mxu0 %vm391_vm2, %v465_v42 }
 0x2c1   : > { %v550_v44 = vpop.f32.mrb[2].mxu0 }
 0x2c2   : > { %v551_v45 = vadd.f32 %v654_v43, %v550_v44  ;;  %v731_v46 = vpop.f32.mrb[3].mxu0 }
 0x2c4   : > { %v554_v47 = vmax.f32 %v551_v45, 0.0 }
 0x2c6   : > { %v555_v48 = vadd.f32 %v554_v47, %v289_v16 }
 0x2c8   : > { %556 = vst.msk [vmem:[%s284_s19] sm:$0xff] %vm301_vm1, %v555_v48 }
 0x2c9   : > { %858 = shalt.err (!%p855_p7)
}
 0x2ca   : > { %s859_s17 = scalar_lea.hbm %s1114_s23, 128  ;;  %s863_s18 = scalar_lea.hbm %s1164_s7, 512 }
 0x2cb   : > { %p860_p8 = scmp.ne.s32.totalorder %s1114_s23, %s859_s17  ;;  %p864_p1 = scmp.lt.u32.totalorder %s1114_s23, %s1164_s7 }
 0x2cc   : > { %p865_p0 = scmp.lt.u32.totalorder %s863_s18, %s859_s17  ;;  %p867_p6 = scmp.lt.u32.totalorder %s859_s17, %s1114_s23 }
 0x2cd   : > { %p861_p11 = pnand %p860_p8, %p1175_p9 }
 0x2ce   : > { %p866_p5 = por %p865_p0, %p864_p1 }
 0x2cf   : > { %p862_p13 = pneg %p861_p11 }
 0x2d0   : > { %p868_p10 = por %p867_p6, %p866_p5 }
 0x2d2   : > { %p869_p12 = pnand %p868_p10, %p862_p13 }
 0x2d4   : > { %872 = shalt.err (!%p869_p12)
}
 0x2d5   : > { %766 = dma.vmem_to_hbm [thread:$0]  (%p1175_p9), %s1116_s20, 128, %s1114_s23, %s558_s29  }
 0x2d6 PF: > { %p778_p2 = scmp.ge.s32.totalorder %s911_s27, 2  ;;  %s583_s21 = sand.u32 1, %s899_s24  }
 0x2d7   : > { %p1176_p3 = scmp.ne.s32.totalorder %s1169_s12, 0  ;;  %s584_s22 = scalar_lea.sflag [#allocation4], %s583_s21 }
 0x2d9   : > { %p773_p4 = pnand %p778_p2, %p1176_p3 }
 0x2db   : > { %894 = dma.done.wait (!%p773_p4), %s584_s22, 128  }
 0x2dc   : > { %896 = vsyncadd (!%p773_p4), %s584_s22, 4294967168  ;;  %p18_p7 = scmp.ge.s32.totalorder %s985_s30, 6   ;;  %s1177_s24 = smov %s903_s25 }
 0x2dd   : > { %s1178_s25 = smov %s907_s26  ;;  %s1179_s26 = smov %s996_s10 }
 0x2de   : > { %s1180_s27 = smov %s985_s30  ;;  %20 = sbr.rel (!%p18_p7) target bundleno = 4 (0x4), region = 88 }
 0x2e5   :  { %589 = vsyncpa [#allocation3], 1 }
 0x2e6   :  { %591 = vsyncpa [#allocation3 + $0x1], 1 }
 0x2e7   :  { %592 = vsyncpa [#allocation4], 1 }
 0x2e8   :  { %594 = vsyncpa [#allocation4 + $0x1], 1 }

</bundles_post_ra>
